<compile_context>
chip_gen: v6e
topology: v6e:2x2x1
jax: 0.10.0
libtpu: 0.0.40
codegen_flags: <defaults>
</compile_context>

<pallas_src>
import functools

import jax
import jax.numpy as jnp
from jax.experimental import pallas as pl
from jax.experimental.pallas import tpu as pltpu


def _round_up(x, m):
    return ((x + m - 1) // m) * m


def _vmem_capacity_bytes():
    """Physical VMEM per TensorCore (conservative fallback = v7x 64 MiB)."""
    try:
        info = pltpu.get_tpu_info()
        cap = getattr(info, "vmem_capacity_bytes", None)
        if cap:
            return int(cap)
    except Exception:
        pass
    return 64 * 1024 * 1024


def _ce_partial_kernel(x_ref, y_ref, out_ref, *, n_valid, tile_n):
    """Per-tile partial sum of cross-entropy losses.

    x_ref:  (TILE_N, C) logits (ragged last tile: out-of-bounds rows hold
            unspecified data; they are masked out below)
    y_ref:  (TILE_N, 1) int32 targets
    out_ref: (1, 8, 128) f32 — partial sum broadcast into a lane-dense slab
    """
    i = pl.program_id(0)

    x = x_ref[...].astype(jnp.float32)            # (TILE_N, C)
    y = y_ref[...]                                # (TILE_N, 1) int32
    tn, c = x.shape

    # Numerically-stable log-sum-exp per row (per-row, so garbage in the
    # ragged tail rows cannot leak into valid rows).
    m = jnp.max(x, axis=-1, keepdims=True)                                # (TILE_N, 1)
    lse = jnp.log(jnp.sum(jnp.exp(x - m), axis=-1, keepdims=True)) + m    # (TILE_N, 1)

    # Pick the target-class logit with a where-select (cmp + vsel, no extra
    # full-tile multiply / cast).
    col = jax.lax.broadcasted_iota(jnp.int32, (tn, c), 1)                 # (TILE_N, C)
    picked = jnp.sum(jnp.where(col == y, x, 0.0), axis=-1, keepdims=True)  # (TILE_N, 1)

    per_row = lse - picked                                                # (TILE_N, 1)

    # Mask out the out-of-bounds rows of the (possibly ragged) last tile.
    # jnp.where is a select, so NaN/Inf from garbage rows cannot propagate.
    row = jax.lax.broadcasted_iota(jnp.int32, (tn, 1), 0) + i * tile_n
    per_row = jnp.where(row < n_valid, per_row, 0.0)

    partial = jnp.sum(per_row)                                            # scalar f32
    # Lane-dense, unmasked store; wrapper reads element [tile, 0, 0].
    out_ref[...] = jnp.full((1, 8, 128), partial, dtype=jnp.float32)


def loss_id(x, y, tau2=1.0):
    """Equivalent of Loss_ID(tau2)(x, y) == F.cross_entropy(x, y) (mean).

    x: (N, C) float logits; y: (N,) int class indices. tau2 is unused in the
    forward pass (matches the PyTorch module).
    """
    x = jnp.asarray(x)
    y = jnp.asarray(y).astype(jnp.int32).reshape(-1, 1)
    n, c = x.shape

    itemsize = jnp.dtype(x.dtype).itemsize
    # VMEM lays the last dim out in 128-wide lanes; budget with that padding.
    c_lanes = _round_up(c, 128)

    vmem_cap = _vmem_capacity_bytes()
    # Per-row VMEM footprint: double-buffered input block + ~2 f32 intermediates
    # (x.astype(f32), exp(x - m)) that the compiler may materialize.
    per_row_vmem = c_lanes * (2 * itemsize + 2 * 4)
    row_budget = (vmem_cap // 2) // max(per_row_vmem, 1)
    tile_n_by_bytes = max(8, (row_budget // 8) * 8)

    # Keep >= 4 row tiles when N allows, so the ("parallel",) axis shards
    # across both v7x TensorCores and the pipeline has work to overlap.
    tile_cap_rows = max(8, _round_up(pl.cdiv(n, 4), 8))
    tile_n = int(max(8, min(tile_n_by_bytes, tile_cap_rows)))
    num_tiles = pl.cdiv(n, tile_n)

    # Scoped VMEM: 3/4 of physical (48 MiB on v7x, 96 MiB on v5e/v6e).
    vmem_limit = int(max(32 << 20, (vmem_cap * 3) // 4))

    kernel = functools.partial(_ce_partial_kernel, n_valid=n, tile_n=tile_n)

    partials = pl.pallas_call(
        kernel,
        out_shape=jax.ShapeDtypeStruct((num_tiles, 8, 128), jnp.float32),
        grid=(num_tiles,),
        in_specs=[
            # Last dim equals the full array dim -> no 128-multiple requirement,
            # and no wrapper-side padding / extra HBM traffic.
            pl.BlockSpec((tile_n, c), lambda i: (i, 0)),
            pl.BlockSpec((tile_n, 1), lambda i: (i, 0)),
        ],
        out_specs=pl.BlockSpec((1, 8, 128), lambda i: (i, 0, 0)),
        compiler_params=pltpu.CompilerParams(
            dimension_semantics=("parallel",),
            vmem_limit_bytes=vmem_limit,
        ),
    )(x, y)

    # Finish the mean reduction on the tiny per-tile partials (divide by the
    # true N, not num_tiles * tile_n).
    return jnp.sum(partials[:, 0, 0]) / n


def _reference(x, y):
    logp = jax.nn.log_softmax(x.astype(jnp.float32), axis=-1)
    nll = -jnp.take_along_axis(logp, y.reshape(-1, 1), axis=-1)
    return jnp.mean(nll)


if __name__ == "__main__":
    key = jax.random.PRNGKey(0)
    kx, ky = jax.random.split(key)
    N, C = 8, 32                       # small shapes: batch=8, num_classes=32
    x = jax.random.normal(kx, (N, C), dtype=jnp.float32)
    y = jax.random.randint(ky, (N,), 0, C, dtype=jnp.int32)

    loss = loss_id(x, y, tau2=0.5)
    jax.block_until_ready(loss)

    ref = _reference(x, y)
    assert jnp.allclose(loss, ref, atol=1e-5, rtol=1e-5), (loss, ref)
    print("KERNEL_OK")
</pallas_src>

<mosaic_0001>
module attributes {stable_mosaic.version = 11 : i64} {
  func.func @_ce_partial_kernel(%arg0: i32, %arg1: memref<8x32xf32, #tpu.memory_space<vmem>>, %arg2: memref<8x1xi32, #tpu.memory_space<vmem>>, %arg3: memref<1x8x128xf32, #tpu.memory_space<vmem>>) attributes {dimension_semantics = [#tpu.dimension_semantics<parallel>], iteration_bounds = array<i64: 1>, scalar_prefetch = 0 : i64, scratch_operands = 0 : i64, tpu.core_type = #tpu.core_type<tc>, window_params = [{transform_indices = @transform_0, window_bounds = array<i64: 8, 32>}, {transform_indices = @transform_1, window_bounds = array<i64: 8, 1>}, {transform_indices = @transform_2, window_bounds = array<i64: 1, 8, 128>}]} {
    %c0 = arith.constant 0 : index
    %c0_0 = arith.constant 0 : index
    %0 = vector.load %arg1[%c0, %c0_0] : memref<8x32xf32, #tpu.memory_space<vmem>>, vector<8x32xf32>
    %c0_1 = arith.constant 0 : index
    %c0_2 = arith.constant 0 : index
    %1 = vector.load %arg2[%c0_1, %c0_2] : memref<8x1xi32, #tpu.memory_space<vmem>>, vector<8x1xi32>
    %cst = arith.constant dense<0xFF800000> : vector<8xf32>
    %2 = vector.multi_reduction <maximumf>, %0, %cst [1] : vector<8x32xf32> to vector<8xf32>
    %3 = vector.shape_cast %2 : vector<8xf32> to vector<8x1xf32>
    %4 = vector.broadcast %3 : vector<8x1xf32> to vector<8x32xf32>
    %5 = arith.subf %0, %4 : vector<8x32xf32>
    %6 = math.exp %5 : vector<8x32xf32>
    %cst_3 = arith.constant dense<0.000000e+00> : vector<8xf32>
    %7 = vector.multi_reduction <add>, %6, %cst_3 [1] : vector<8x32xf32> to vector<8xf32>
    %8 = vector.shape_cast %7 : vector<8xf32> to vector<8x1xf32>
    %9 = math.log %8 : vector<8x1xf32>
    %10 = arith.addf %9, %3 : vector<8x1xf32>
    %11 = tpu.iota {dimensions = array<i32: 1>} : vector<8x32xi32>
    %12 = vector.broadcast %1 : vector<8x1xi32> to vector<8x32xi32>
    %13 = arith.cmpi eq, %11, %12 : vector<8x32xi32>
    %cst_4 = arith.constant 0.000000e+00 : f32
    %14 = vector.broadcast %cst_4 : f32 to vector<8x32xf32>
    %15 = arith.select %13, %0, %14 : vector<8x32xi1>, vector<8x32xf32>
    %cst_5 = arith.constant dense<0.000000e+00> : vector<8xf32>
    %16 = vector.multi_reduction <add>, %15, %cst_5 [1] : vector<8x32xf32> to vector<8xf32>
    %17 = vector.shape_cast %16 : vector<8xf32> to vector<8x1xf32>
    %18 = arith.subf %10, %17 : vector<8x1xf32>
    %19 = tpu.iota {dimensions = array<i32: 0>} : vector<8x1xi32>
    %c8_i32 = arith.constant 8 : i32
    %20 = arith.muli %arg0, %c8_i32 : i32
    %21 = vector.broadcast %20 : i32 to vector<8x1xi32>
    %22 = arith.addi %19, %21 : vector<8x1xi32>
    %c8_i32_6 = arith.constant 8 : i32
    %23 = vector.broadcast %c8_i32_6 : i32 to vector<8x1xi32>
    %24 = arith.cmpi slt, %22, %23 : vector<8x1xi32>
    %cst_7 = arith.constant 0.000000e+00 : f32
    %25 = vector.broadcast %cst_7 : f32 to vector<8x1xf32>
    %26 = arith.select %24, %18, %25 : vector<8x1xi1>, vector<8x1xf32>
    %27 = vector.shape_cast %26 : vector<8x1xf32> to vector<1x8x1xf32>
    %cst_8 = arith.constant dense<0.000000e+00> : vector<1xf32>
    %28 = vector.multi_reduction <add>, %27, %cst_8 [1, 2] : vector<1x8x1xf32> to vector<1xf32>
    %29 = vector.shape_cast %28 : vector<1xf32> to vector<1x1x1xf32>
    %30 = vector.extract %29[0, 0, 0] : f32 from vector<1x1x1xf32>
    %31 = vector.broadcast %30 : f32 to vector<1x8x128xf32>
    %c0_9 = arith.constant 0 : index
    %c0_10 = arith.constant 0 : index
    %c0_11 = arith.constant 0 : index
    %32 = vector.load %arg3[%c0_9, %c0_10, %c0_11] : memref<1x8x128xf32, #tpu.memory_space<vmem>>, vector<1x8x128xf32>
    tpu.vector_store %arg3[%c0_9, %c0_10, %c0_11], %31 {strides = array<i32>} : memref<1x8x128xf32, #tpu.memory_space<vmem>>, vector<1x8x128xf32>,
    return
  }
  func.func @transform_0(%arg0: i32) -> (i32, i32) {
    %c0_i32 = arith.constant 0 : i32
    %c0_i32_0 = arith.constant 0 : i32
    return %arg0, %c0_i32 : i32, i32
  }
  func.func @transform_1(%arg0: i32) -> (i32, i32) {
    %c0_i32 = arith.constant 0 : i32
    %c0_i32_0 = arith.constant 0 : i32
    return %arg0, %c0_i32 : i32, i32
  }
  func.func @transform_2(%arg0: i32) -> (i32, i32, i32) {
    %c0_i32 = arith.constant 0 : i32
    %c0_i32_0 = arith.constant 0 : i32
    %c0_i32_1 = arith.constant 0 : i32
    return %arg0, %c0_i32, %c0_i32_0 : i32, i32, i32
  }
}

</mosaic_0001>

<bundles_post_ra>
// kernel: tpu_custom_call.1
= control target key start
LH: loop header
LB: loop body
LE: loop exit
PB: predicated region body
PF: predicated region fallthrough
CT: control target
= control target key end

     0   :  { %vm14_vm0 = vcmask 261120   ;;  %s132_s0 = inlined_call_operand.vmem [shape: f32[8,32], index: 0, kind: input, shape index: {}]   ;;  %s133_s1 = inlined_call_operand.vmem [shape: s32[8,1], index: 1, kind: input, shape index: {}]   ;;  %s134_s2 = inlined_call_operand.hbm [shape: f32[1,8,128], index: 2, kind: output, shape index: {}]  }
   0x1   :  { %v12_v0 = vld [vmem:[%s132_s0] sm:$0xff] }
   0x2   :  { %7 = vsyncpa [#allocation3], 0  ;;  %v15_v1 = vsel %vm14_vm0, %v12_v0, -inf  ;;  %v103_v2 = vmov 0   ;;  %v13_v3 = vld [vmem:[%s133_s1] sm:$0xff]  ;;  %v27_v7 = vlaneseq  ;;  %vm45_vm2 = vcmask 7168  }
   0x3   :  { %76 = vset.pattern.permute.xlu0 %v103_v2  ;;  %s104_s0 = smov [#allocation2]  }
   0x4   :  { %16 = vmax.xlane.f32.xlu0 %v15_v1  ;;  %v28_v8 = vand.u32 127, %v27_v7  ;;  %s64_s1 = sshll.u32 %s104_s0, 4  ;;  %s65_s1 = int_to_ptr.vmem [resolvable:$true] %s64_s1 }
   0x5   :  { %s81_s14 = scalar_lea.vmem %s65_s1, 128  ;;  %p86_p1 = scmp.lt.s32.totalorder %s65_s1, %s65_s1 }
   0x6   :  { %p82_p0 = scmp.ne.s32.totalorder %s65_s1, %s81_s14  ;;  %p87_p2 = scmp.lt.s32.totalorder %s81_s14, %s81_s14 }
   0x8   :  { %p88_p3 = por %p87_p2, %p86_p1 }
   0xa   :  { %p89_p4 = pnand %p88_p3, %p82_p0 }
  0x1a   :  { %30 = vperm.xlu0 %76, %v13_v3  }
  0x8d   :  { %v17_v4 = vpop.xlane.xlu0 %16 }
  0x8e   :  { %v18_v5 = vsub.f32 %v12_v0, %v17_v4 }
  0x90   :  { %v19_v6 = vmul.f32 1.442695, %v18_v5 }
  0x92   :  { %77 = vpow2.f32 %v19_v6 }
  0x95   :  { %v31_v9 = vpop.permute.xlu0 %30 }
  0x96   :  { %vm32_vm1 = vcmp.eq.s32.totalorder %v28_v8, %v31_v9 }
  0x97   :  { %v33_v11 = vsel %vm32_vm1, %v12_v0, 0.0 }
  0x98   :  { %v34_v13 = vsel %vm14_vm0, %v33_v11, 0.0 }
  0x9f   :  { %v78_v10 = vpop.eup %77 }
  0xa0   :  { %v21_v12 = vsel %vm14_vm0, %v78_v10, 0.0 }
  0xa1   :  { %22 = vadd.xlane.f32.xlu1 %v21_v12 }
  0xa5   :  { %35 = vadd.xlane.f32.xlu1 %v34_v13 }
 0x12a   :  { %v23_v14 = vpop.xlane.xlu1 %22 }
 0x12b   :  { %79 = vlog2.f32 %v23_v14 }
 0x12e   :  { %v36_v17 = vpop.xlane.xlu1 %35 }
 0x138   :  { %v80_v15 = vpop.eup %79 }
 0x139   :  { %v25_v16 = vmul.f32 0.6931472, %v80_v15 }
 0x13b   :  { %v26_v18 = vadd.f32 %v25_v16, %v17_v4 }
 0x13d   :  { %v37_v19 = vsub.f32 %v26_v18, %v36_v17 }
 0x13f   :  { %v46_v20 = vsel %vm45_vm2, %v37_v19, 0.0 }
 0x140   :  { %47 = vadd.xlane.f32.xlu1 %v46_v20 }
 0x1c9   :  { %v48_v21 = vpop.xlane.xlu1 %47 }
 0x1ca   :  { %v49_v22 = vrot.slane %v48_v21, 4 }
 0x1cc   :  { %v50_v23 = vadd.f32 %v49_v22, %v48_v21 }
 0x1ce   :  { %v51_v24 = vrot.slane %v50_v23, 2 }
 0x1d0   :  { %v52_v25 = vadd.f32 %v51_v24, %v50_v23 }
 0x1d2   :  { %v53_v26 = vrot.slane %v52_v25, 1 }
 0x1d4   :  { %v54_v27 = vadd.f32 %v53_v26, %v52_v25 }
 0x1d6   :  { %72 = vpush %v54_v27 }
 0x207   :  { %s73_s13 = spop %72 }
 0x208   :  { %v56_v28 = vstv %s73_s13 }
 0x209   :  { %57 = vst [vmem:[#allocation2] sm:$0xff] %v56_v28 }
 0x20a   :  { %92 = shalt.err (!%p89_p4)
}
 0x20b   :  { %67 = dma.vmem_to_hbm [thread:$0]  %s65_s1, 128, %s134_s2, [#allocation3]  }
 0x20c   :  { %101 = dma.done.wait [#allocation3], 128  }
 0x20d   :  { %102 = vsyncadd [#allocation3], 4294967168 }
 0x20e   :  { %71 = vsyncpa [#allocation3], 1 }

</bundles_post_ra>
